<compile_context>
chip_gen: v5e
topology: v5e:2x2
jax: 0.10.0
libtpu: 0.0.40
codegen_flags: <defaults>
</compile_context>

<pallas_src>
import jax
import jax.numpy as jnp
from jax.experimental import pallas as pl
from jax.experimental.pallas import tpu as pltpu

EPS = 1e-5      # PyTorch BatchNorm1d default eps
MU_GP = 10.0    # mu in WDLoss.__init__


def _wd_kernel(src_ref, tgt_ref, t_ref, vec_ref, w1_ref, w2_ref, out_ref):
    src = src_ref[...]            # [B, D]
    tgt = tgt_ref[...]            # [B, D]
    t = t_ref[...]                # [B, 1]
    vecs = vec_ref[...]           # [8, H]   (b1,g1,be1,b2,g2,be2,W3,b3-row)
    W1 = w1_ref[...]              # [H, D]   native nn.Linear layout [out, in]
    W2 = w2_ref[...]              # [H, H]   native [out, in]

    B = src.shape[0]
    H = vecs.shape[1]

    b1, g1, be1 = vecs[0:1], vecs[1:2], vecs[2:3]
    b2, g2, be2 = vecs[3:4], vecs[4:5], vecs[5:6]
    W3 = vecs[6:7]                # [1, H]  (original nn.Linear(H,1) weight layout)
    b3 = vecs[7:8, 0:1]           # [1, 1]

    def linear_t(x, W):
        """x @ W.T with W in native [out,in] layout — no transposes materialized."""
        return jax.lax.dot_general(
            x, W, dimension_numbers=(((1,), (1,)), ((), ())),
            preferred_element_type=jnp.float32)

    # ---------------- layer 1: only source/target hit the MXU --------------------------
    z1_s = linear_t(src, W1) + b1                 # [B, H]
    z1_t = linear_t(tgt, W1) + b1                 # [B, H]
    # exact: (t*src + (1-t)*tgt) @ W1^T + b1  (bias folds since t + (1-t) = 1)
    z1_i = t * z1_s + (1.0 - t) * z1_t            # [B, H]
    z1 = jnp.stack([z1_s, z1_t, z1_i], axis=0)    # [3, B, H]  (only stacked copy)

    def bn_fwd(z, g, be):
        """Per-segment (= per original discriminator call) training-mode BatchNorm."""
        mu = jnp.mean(z, axis=1, keepdims=True)                  # [3, 1, H]
        var = jnp.mean((z - mu) ** 2, axis=1, keepdims=True)     # biased var
        inv = jax.lax.rsqrt(var + EPS)
        xhat = (z - mu) * inv
        return g * xhat + be, xhat, inv

    bn1, xh1, inv1 = bn_fwd(z1, g1, be1)
    h1 = jnp.maximum(bn1, 0.0)                                   # [3, B, H]

    # layer 2 fused over all 3 segments; [3,B,H] <-> [3B,H] reshapes are free for B % 8 == 0
    z2 = linear_t(h1.reshape(3 * B, H), W2).reshape(3, B, H) + b2
    bn2, xh2, inv2 = bn_fwd(z2, g2, be2)
    h2 = jnp.maximum(bn2, 0.0)

    # layer 3: out_dim == 1 -> VPU multiply + lane reduce instead of an MXU matmul
    z3 = jnp.sum(h2 * W3, axis=-1, keepdims=True) + b3           # [3, B, 1]
    s = 0.5 * (1.0 + jnp.tanh(0.5 * z3))                         # sigmoid via EUP tanh

    source_loss = jnp.mean(s[0], axis=0, keepdims=True)          # [1, 1]
    target_loss = jnp.mean(s[1], axis=0, keepdims=True)          # [1, 1]
    s_int = s[2]                                                 # [B, 1]

    # -------- gradient penalty: analytic backward of mean(D(interp)) wrt interp --------
    bn1_i, xh1_i, inv1_i = bn1[2], xh1[2], inv1[2]               # [B,H], [B,H], [1,H]
    bn2_i, xh2_i, inv2_i = bn2[2], xh2[2], inv2[2]

    def bn_bwd(dy, xhat, inv, g):
        dxhat = dy * g
        return inv * (dxhat
                      - jnp.mean(dxhat, axis=0, keepdims=True)
                      - xhat * jnp.mean(dxhat * xhat, axis=0, keepdims=True))

    dz3 = s_int * (1.0 - s_int) * (1.0 / B)                      # [B, 1]
    dh2 = dz3 * W3                                               # [B, H] broadcast (no K=1 matmul)
    dbn2 = jnp.where(bn2_i > 0.0, dh2, 0.0)                      # ReLU bwd
    dz2 = bn_bwd(dbn2, xh2_i, inv2_i, g2)
    dh1 = jnp.dot(dz2, W2, preferred_element_type=jnp.float32)   # [B, H]  (contract 'out' dim)
    dbn1 = jnp.where(bn1_i > 0.0, dh1, 0.0)
    dz1 = bn_bwd(dbn1, xh1_i, inv1_i, g1)
    dx = jnp.dot(dz1, W1, preferred_element_type=jnp.float32)    # [B, D]

    # TODO(synk): if this kernel is ever differentiated itself, add an eps inside the sqrt
    # (the norm's gradient is undefined at exactly zero); forward value is unaffected.
    norms = jnp.sqrt(jnp.sum(dx * dx, axis=1, keepdims=True))    # [B, 1]
    gp = jnp.mean((norms - 1.0) ** 2, axis=0, keepdims=True)     # [1, 1]

    out_ref[...] = source_loss - target_loss - MU_GP * gp


def wd_loss_pallas(source, target, t, params):
    """Returns the scalar adversarial W-GP loss (forward value of WDLoss)."""
    W1, b1, g1, be1, W2, b2, g2, be2, W3, b3 = params
    B, D = source.shape
    H = W1.shape[0]

    # TODO(synk): for B % 8 != 0, pad the batch host-side (masked rows excluded from the
    # per-segment BN means); the [3,B,H] reshapes assume sublane-aligned segments.
    assert B % 8 == 0, "batch must be a multiple of 8 (sublane tile) for this kernel"

    # Tiny vector pack (8 rows of [1,H]) — keeps the launch at 6 DMAs; weights and
    # activations are passed untouched (no host transposes / concats).
    b3_row = jnp.broadcast_to(b3.astype(jnp.float32), (1, H))    # only [0,0] used
    vecs = jnp.concatenate([b1, g1, be1, b2, g2, be2, W3, b3_row], axis=0)  # [8, H]

    # Grid-less, everything-resident design: budget VMEM explicitly (v7x: 64 MiB physical,
    # 32 MiB scoped default; v5e: 16 MiB scoped default).
    vmem_bytes = 4 * (3 * B * D                 # source, target, dx
                      + (D + H + 8) * H         # W1, W2, vecs
                      + 18 * 3 * B * H          # stacked activations / BN temps / backward
                      + 2 * B + 128)            # t, per-row scalars, output tile
    # TODO(synk): beyond this budget a two-pass tiled BN variant (stats pass + normalize
    # pass over a B-grid) is required; not needed at realistic discriminator sizes.
    assert vmem_bytes <= (48 << 20), "batch/feature size exceeds whole-array VMEM budget"
    vmem_limit = int(min(max(2 * vmem_bytes, 4 << 20), 64 << 20))

    flops = (2 * 2 * B * D * H          # layer-1 fwd (src + tgt)
             + 2 * 3 * B * H * H        # layer-2 fwd (3 segments)
             + 2 * B * H * H            # backward dz2 @ W2
             + 2 * B * H * D            # backward dz1 @ W1
             + 40 * 3 * B * H)          # BN / ReLU / elementwise
    cost = pl.CostEstimate(
        flops=flops,
        transcendentals=3 * B + 6 * H + B,   # sigmoid-tanh, BN rsqrt, norm sqrt
        bytes_accessed=4 * (2 * B * D + B + 8 * H + H * D + H * H + 1))

    vmem_spec = pl.BlockSpec(memory_space=pltpu.MemorySpace.VMEM)
    out = pl.pallas_call(
        _wd_kernel,
        out_shape=jax.ShapeDtypeStruct((1, 1), jnp.float32),
        in_specs=[vmem_spec] * 6,
        out_specs=vmem_spec,
        compiler_params=pltpu.CompilerParams(vmem_limit_bytes=vmem_limit),
        cost_estimate=cost,
    )(source, target, t, vecs, W1, W2)
    return out[0, 0]


# ------------------------- pure-JAX reference (for checking) -------------------------
def _disc_ref(x, params):
    W1, b1, g1, be1, W2, b2, g2, be2, W3, b3 = params

    def bn(z, g, be):
        mu = z.mean(0, keepdims=True)
        var = ((z - mu) ** 2).mean(0, keepdims=True)
        return g * (z - mu) / jnp.sqrt(var + EPS) + be

    h1 = jnp.maximum(bn(x @ W1.T + b1, g1, be1), 0.0)
    h2 = jnp.maximum(bn(h1 @ W2.T + b2, g2, be2), 0.0)
    return jax.nn.sigmoid(h2 @ W3.T + b3)


def _wd_ref(source, target, t, params):
    src_loss = _disc_ref(source, params).mean()
    tgt_loss = _disc_ref(target, params).mean()
    interp = t * source + (1.0 - t) * target
    grads = jax.grad(lambda x: _disc_ref(x, params).mean())(interp)
    gn = jnp.linalg.norm(grads.reshape(grads.shape[0], -1), axis=1)
    gp = jnp.mean((gn - 1.0) ** 2)
    return src_loss - tgt_loss - MU_GP * gp


if __name__ == "__main__":
    B, D, H = 8, 32, 32   # batch, feature dim (Discriminator input_dim), hidden dim

    key = jax.random.PRNGKey(0)
    ks = jax.random.split(key, 12)
    source = jax.random.normal(ks[0], (B, D), jnp.float32)
    target = jax.random.normal(ks[1], (B, D), jnp.float32) + 0.5
    # torch.rand([B,1]) equivalent (deterministic here); expanded over features by broadcast.
    t = jax.random.uniform(ks[2], (B, 1), dtype=jnp.float32)

    # Deterministic discriminator parameters (Linear weights [out,in], biases/BN as [1,H]).
    W1 = 0.3 * jax.random.normal(ks[3], (H, D), jnp.float32)
    b1 = 0.1 * jax.random.normal(ks[4], (1, H), jnp.float32)
    g1 = 1.0 + 0.1 * jax.random.normal(ks[5], (1, H), jnp.float32)
    be1 = 0.05 * jax.random.normal(ks[6], (1, H), jnp.float32)
    W2 = 0.3 * jax.random.normal(ks[7], (H, H), jnp.float32)
    b2 = 0.1 * jax.random.normal(ks[8], (1, H), jnp.float32)
    g2 = 1.0 + 0.1 * jax.random.normal(ks[9], (1, H), jnp.float32)
    be2 = 0.05 * jax.random.normal(ks[10], (1, H), jnp.float32)
    W3 = 0.3 * jax.random.normal(ks[11], (1, H), jnp.float32)
    b3 = jnp.zeros((1, 1), jnp.float32)
    params = (W1, b1, g1, be1, W2, b2, g2, be2, W3, b3)

    loss = wd_loss_pallas(source, target, t, params)
    loss = jax.block_until_ready(loss)

    ref = jax.block_until_ready(_wd_ref(source, target, t, params))
    assert jnp.allclose(loss, ref, rtol=1e-4, atol=5e-5), (loss, ref)

    print("KERNEL_OK")
</pallas_src>

<mosaic_0001>
module attributes {stable_mosaic.version = 11 : i64} {
  func.func @_wd_kernel(%arg0: memref<8x32xf32, #tpu.memory_space<vmem>>, %arg1: memref<8x32xf32, #tpu.memory_space<vmem>>, %arg2: memref<8x1xf32, #tpu.memory_space<vmem>>, %arg3: memref<8x32xf32, #tpu.memory_space<vmem>>, %arg4: memref<32x32xf32, #tpu.memory_space<vmem>>, %arg5: memref<32x32xf32, #tpu.memory_space<vmem>>, %arg6: memref<1x1xf32, #tpu.memory_space<vmem>>) attributes {dimension_semantics = [], scalar_prefetch = 0 : i64, scratch_operands = 0 : i64, tpu.core_type = #tpu.core_type<tc>} {
    %c0 = arith.constant 0 : index
    %c0_0 = arith.constant 0 : index
    %0 = vector.load %arg0[%c0, %c0_0] : memref<8x32xf32, #tpu.memory_space<vmem>>, vector<8x32xf32>
    %c0_1 = arith.constant 0 : index
    %c0_2 = arith.constant 0 : index
    %1 = vector.load %arg1[%c0_1, %c0_2] : memref<8x32xf32, #tpu.memory_space<vmem>>, vector<8x32xf32>
    %c0_3 = arith.constant 0 : index
    %c0_4 = arith.constant 0 : index
    %2 = vector.load %arg2[%c0_3, %c0_4] : memref<8x1xf32, #tpu.memory_space<vmem>>, vector<8x1xf32>
    %c0_5 = arith.constant 0 : index
    %c0_6 = arith.constant 0 : index
    %3 = vector.load %arg3[%c0_5, %c0_6] : memref<8x32xf32, #tpu.memory_space<vmem>>, vector<8x32xf32>
    %c0_7 = arith.constant 0 : index
    %c0_8 = arith.constant 0 : index
    %4 = vector.load %arg4[%c0_7, %c0_8] : memref<32x32xf32, #tpu.memory_space<vmem>>, vector<32x32xf32>
    %c0_9 = arith.constant 0 : index
    %c0_10 = arith.constant 0 : index
    %5 = vector.load %arg5[%c0_9, %c0_10] : memref<32x32xf32, #tpu.memory_space<vmem>>, vector<32x32xf32>
    %6 = vector.extract_strided_slice %3 {offsets = [0, 0], sizes = [1, 32], strides = [1, 1]} : vector<8x32xf32> to vector<1x32xf32>
    %7 = vector.extract_strided_slice %3 {offsets = [1, 0], sizes = [1, 32], strides = [1, 1]} : vector<8x32xf32> to vector<1x32xf32>
    %8 = vector.extract_strided_slice %3 {offsets = [2, 0], sizes = [1, 32], strides = [1, 1]} : vector<8x32xf32> to vector<1x32xf32>
    %9 = vector.extract_strided_slice %3 {offsets = [3, 0], sizes = [1, 32], strides = [1, 1]} : vector<8x32xf32> to vector<1x32xf32>
    %10 = vector.extract_strided_slice %3 {offsets = [4, 0], sizes = [1, 32], strides = [1, 1]} : vector<8x32xf32> to vector<1x32xf32>
    %11 = vector.extract_strided_slice %3 {offsets = [5, 0], sizes = [1, 32], strides = [1, 1]} : vector<8x32xf32> to vector<1x32xf32>
    %12 = vector.extract_strided_slice %3 {offsets = [6, 0], sizes = [1, 32], strides = [1, 1]} : vector<8x32xf32> to vector<1x32xf32>
    %13 = vector.extract_strided_slice %3 {offsets = [7, 0], sizes = [1, 1], strides = [1, 1]} : vector<8x32xf32> to vector<1x1xf32>
    %cst = arith.constant dense<0.000000e+00> : vector<8x32xf32>
    %14 = tpu.matmul %0, %4, %cst {dimension_numbers = #tpu.dot_dimension_numbers<[1], [1], [0], [0], [0, 0, 1, 0], [], []>} : vector<8x32xf32>, vector<32x32xf32>, vector<8x32xf32> -> vector<8x32xf32>
    %15 = vector.broadcast %6 : vector<1x32xf32> to vector<8x32xf32>
    %16 = arith.addf %14, %15 : vector<8x32xf32>
    %cst_11 = arith.constant dense<0.000000e+00> : vector<8x32xf32>
    %17 = tpu.matmul %1, %4, %cst_11 {dimension_numbers = #tpu.dot_dimension_numbers<[1], [1], [0], [0], [0, 0, 1, 0], [], []>} : vector<8x32xf32>, vector<32x32xf32>, vector<8x32xf32> -> vector<8x32xf32>
    %18 = vector.broadcast %6 : vector<1x32xf32> to vector<8x32xf32>
    %19 = arith.addf %17, %18 : vector<8x32xf32>
    %20 = vector.broadcast %2 : vector<8x1xf32> to vector<8x32xf32>
    %21 = arith.mulf %20, %16 : vector<8x32xf32>
    %cst_12 = arith.constant 1.000000e+00 : f32
    %22 = vector.broadcast %cst_12 : f32 to vector<8x1xf32>
    %23 = arith.subf %22, %2 : vector<8x1xf32>
    %24 = vector.broadcast %23 : vector<8x1xf32> to vector<8x32xf32>
    %25 = arith.mulf %24, %19 : vector<8x32xf32>
    %26 = arith.addf %21, %25 : vector<8x32xf32>
    %27 = vector.shape_cast %16 : vector<8x32xf32> to vector<1x8x32xf32>
    %28 = vector.shape_cast %19 : vector<8x32xf32> to vector<1x8x32xf32>
    %29 = vector.shape_cast %26 : vector<8x32xf32> to vector<1x8x32xf32>
    %30 = tpu.concatenate %27, %28, %29 in 0 : vector<1x8x32xf32>, vector<1x8x32xf32>, vector<1x8x32xf32> -> vector<3x8x32xf32>
    %cst_13 = arith.constant dense<0.000000e+00> : vector<3x32xf32>
    %31 = vector.multi_reduction <add>, %30, %cst_13 [1] : vector<3x8x32xf32> to vector<3x32xf32>
    %32 = vector.shape_cast %31 : vector<3x32xf32> to vector<3x1x32xf32>
    %cst_14 = arith.constant 8.000000e+00 : f32
    %33 = vector.broadcast %cst_14 : f32 to vector<3x1x32xf32>
    %34 = arith.divf %32, %33 : vector<3x1x32xf32>
    %35 = vector.broadcast %34 : vector<3x1x32xf32> to vector<3x8x32xf32>
    %36 = arith.subf %30, %35 : vector<3x8x32xf32>
    %37 = arith.mulf %36, %36 : vector<3x8x32xf32>
    %cst_15 = arith.constant dense<0.000000e+00> : vector<3x32xf32>
    %38 = vector.multi_reduction <add>, %37, %cst_15 [1] : vector<3x8x32xf32> to vector<3x32xf32>
    %39 = vector.shape_cast %38 : vector<3x32xf32> to vector<3x1x32xf32>
    %cst_16 = arith.constant 8.000000e+00 : f32
    %40 = vector.broadcast %cst_16 : f32 to vector<3x1x32xf32>
    %41 = arith.divf %39, %40 : vector<3x1x32xf32>
    %cst_17 = arith.constant 9.99999974E-6 : f32
    %42 = vector.broadcast %cst_17 : f32 to vector<3x1x32xf32>
    %43 = arith.addf %41, %42 : vector<3x1x32xf32>
    %44 = math.rsqrt %43 : vector<3x1x32xf32>
    %45 = vector.broadcast %34 : vector<3x1x32xf32> to vector<3x8x32xf32>
    %46 = arith.subf %30, %45 : vector<3x8x32xf32>
    %47 = vector.broadcast %44 : vector<3x1x32xf32> to vector<3x8x32xf32>
    %48 = arith.mulf %46, %47 : vector<3x8x32xf32>
    %49 = vector.shape_cast %7 : vector<1x32xf32> to vector<1x1x32xf32>
    %50 = vector.broadcast %49 : vector<1x1x32xf32> to vector<3x8x32xf32>
    %51 = arith.mulf %50, %48 : vector<3x8x32xf32>
    %52 = vector.shape_cast %8 : vector<1x32xf32> to vector<1x1x32xf32>
    %53 = vector.broadcast %52 : vector<1x1x32xf32> to vector<3x8x32xf32>
    %54 = arith.addf %51, %53 : vector<3x8x32xf32>
    %cst_18 = arith.constant 0.000000e+00 : f32
    %55 = vector.broadcast %cst_18 : f32 to vector<3x8x32xf32>
    %56 = arith.maximumf %54, %55 : vector<3x8x32xf32>
    %57 = vector.shape_cast %56 : vector<3x8x32xf32> to vector<24x32xf32>
    %cst_19 = arith.constant dense<0.000000e+00> : vector<24x32xf32>
    %58 = tpu.matmul %57, %5, %cst_19 {dimension_numbers = #tpu.dot_dimension_numbers<[1], [1], [0], [0], [0, 0, 1, 0], [], []>} : vector<24x32xf32>, vector<32x32xf32>, vector<24x32xf32> -> vector<24x32xf32>
    %59 = vector.shape_cast %58 : vector<24x32xf32> to vector<3x8x32xf32>
    %60 = vector.shape_cast %9 : vector<1x32xf32> to vector<1x1x32xf32>
    %61 = vector.broadcast %60 : vector<1x1x32xf32> to vector<3x8x32xf32>
    %62 = arith.addf %59, %61 : vector<3x8x32xf32>
    %cst_20 = arith.constant dense<0.000000e+00> : vector<3x32xf32>
    %63 = vector.multi_reduction <add>, %62, %cst_20 [1] : vector<3x8x32xf32> to vector<3x32xf32>
    %64 = vector.shape_cast %63 : vector<3x32xf32> to vector<3x1x32xf32>
    %cst_21 = arith.constant 8.000000e+00 : f32
    %65 = vector.broadcast %cst_21 : f32 to vector<3x1x32xf32>
    %66 = arith.divf %64, %65 : vector<3x1x32xf32>
    %67 = vector.broadcast %66 : vector<3x1x32xf32> to vector<3x8x32xf32>
    %68 = arith.subf %62, %67 : vector<3x8x32xf32>
    %69 = arith.mulf %68, %68 : vector<3x8x32xf32>
    %cst_22 = arith.constant dense<0.000000e+00> : vector<3x32xf32>
    %70 = vector.multi_reduction <add>, %69, %cst_22 [1] : vector<3x8x32xf32> to vector<3x32xf32>
    %71 = vector.shape_cast %70 : vector<3x32xf32> to vector<3x1x32xf32>
    %cst_23 = arith.constant 8.000000e+00 : f32
    %72 = vector.broadcast %cst_23 : f32 to vector<3x1x32xf32>
    %73 = arith.divf %71, %72 : vector<3x1x32xf32>
    %cst_24 = arith.constant 9.99999974E-6 : f32
    %74 = vector.broadcast %cst_24 : f32 to vector<3x1x32xf32>
    %75 = arith.addf %73, %74 : vector<3x1x32xf32>
    %76 = math.rsqrt %75 : vector<3x1x32xf32>
    %77 = vector.broadcast %66 : vector<3x1x32xf32> to vector<3x8x32xf32>
    %78 = arith.subf %62, %77 : vector<3x8x32xf32>
    %79 = vector.broadcast %76 : vector<3x1x32xf32> to vector<3x8x32xf32>
    %80 = arith.mulf %78, %79 : vector<3x8x32xf32>
    %81 = vector.shape_cast %10 : vector<1x32xf32> to vector<1x1x32xf32>
    %82 = vector.broadcast %81 : vector<1x1x32xf32> to vector<3x8x32xf32>
    %83 = arith.mulf %82, %80 : vector<3x8x32xf32>
    %84 = vector.shape_cast %11 : vector<1x32xf32> to vector<1x1x32xf32>
    %85 = vector.broadcast %84 : vector<1x1x32xf32> to vector<3x8x32xf32>
    %86 = arith.addf %83, %85 : vector<3x8x32xf32>
    %cst_25 = arith.constant 0.000000e+00 : f32
    %87 = vector.broadcast %cst_25 : f32 to vector<3x8x32xf32>
    %88 = arith.maximumf %86, %87 : vector<3x8x32xf32>
    %89 = vector.shape_cast %12 : vector<1x32xf32> to vector<1x1x32xf32>
    %90 = vector.broadcast %89 : vector<1x1x32xf32> to vector<3x8x32xf32>
    %91 = arith.mulf %88, %90 : vector<3x8x32xf32>
    %cst_26 = arith.constant dense<0.000000e+00> : vector<3x8xf32>
    %92 = vector.multi_reduction <add>, %91, %cst_26 [2] : vector<3x8x32xf32> to vector<3x8xf32>
    %93 = vector.shape_cast %92 : vector<3x8xf32> to vector<3x8x1xf32>
    %94 = vector.shape_cast %13 : vector<1x1xf32> to vector<1x1x1xf32>
    %95 = vector.broadcast %94 : vector<1x1x1xf32> to vector<3x8x1xf32>
    %96 = arith.addf %93, %95 : vector<3x8x1xf32>
    %cst_27 = arith.constant 5.000000e-01 : f32
    %97 = vector.broadcast %cst_27 : f32 to vector<3x8x1xf32>
    %98 = arith.mulf %97, %96 : vector<3x8x1xf32>
    %99 = math.tanh %98 : vector<3x8x1xf32>
    %cst_28 = arith.constant 1.000000e+00 : f32
    %100 = vector.broadcast %cst_28 : f32 to vector<3x8x1xf32>
    %101 = arith.addf %100, %99 : vector<3x8x1xf32>
    %cst_29 = arith.constant 5.000000e-01 : f32
    %102 = vector.broadcast %cst_29 : f32 to vector<3x8x1xf32>
    %103 = arith.mulf %102, %101 : vector<3x8x1xf32>
    %104 = vector.extract_strided_slice %103 {offsets = [0, 0, 0], sizes = [1, 8, 1], strides = [1, 1, 1]} : vector<3x8x1xf32> to vector<1x8x1xf32>
    %105 = vector.shape_cast %104 : vector<1x8x1xf32> to vector<8x1xf32>
    %cst_30 = arith.constant dense<0.000000e+00> : vector<1xf32>
    %106 = vector.multi_reduction <add>, %105, %cst_30 [0] : vector<8x1xf32> to vector<1xf32>
    %107 = vector.shape_cast %106 : vector<1xf32> to vector<1x1xf32>
    %cst_31 = arith.constant 8.000000e+00 : f32
    %108 = vector.broadcast %cst_31 : f32 to vector<1x1xf32>
    %109 = arith.divf %107, %108 : vector<1x1xf32>
    %110 = vector.extract_strided_slice %103 {offsets = [1, 0, 0], sizes = [1, 8, 1], strides = [1, 1, 1]} : vector<3x8x1xf32> to vector<1x8x1xf32>
    %111 = vector.shape_cast %110 : vector<1x8x1xf32> to vector<8x1xf32>
    %cst_32 = arith.constant dense<0.000000e+00> : vector<1xf32>
    %112 = vector.multi_reduction <add>, %111, %cst_32 [0] : vector<8x1xf32> to vector<1xf32>
    %113 = vector.shape_cast %112 : vector<1xf32> to vector<1x1xf32>
    %cst_33 = arith.constant 8.000000e+00 : f32
    %114 = vector.broadcast %cst_33 : f32 to vector<1x1xf32>
    %115 = arith.divf %113, %114 : vector<1x1xf32>
    %116 = vector.extract_strided_slice %103 {offsets = [2, 0, 0], sizes = [1, 8, 1], strides = [1, 1, 1]} : vector<3x8x1xf32> to vector<1x8x1xf32>
    %117 = vector.shape_cast %116 : vector<1x8x1xf32> to vector<8x1xf32>
    %118 = vector.extract_strided_slice %54 {offsets = [2, 0, 0], sizes = [1, 8, 32], strides = [1, 1, 1]} : vector<3x8x32xf32> to vector<1x8x32xf32>
    %119 = vector.shape_cast %118 : vector<1x8x32xf32> to vector<8x32xf32>
    %120 = vector.extract_strided_slice %48 {offsets = [2, 0, 0], sizes = [1, 8, 32], strides = [1, 1, 1]} : vector<3x8x32xf32> to vector<1x8x32xf32>
    %121 = vector.shape_cast %120 : vector<1x8x32xf32> to vector<8x32xf32>
    %122 = vector.extract_strided_slice %44 {offsets = [2, 0, 0], sizes = [1, 1, 32], strides = [1, 1, 1]} : vector<3x1x32xf32> to vector<1x1x32xf32>
    %123 = vector.shape_cast %122 : vector<1x1x32xf32> to vector<1x32xf32>
    %124 = vector.extract_strided_slice %86 {offsets = [2, 0, 0], sizes = [1, 8, 32], strides = [1, 1, 1]} : vector<3x8x32xf32> to vector<1x8x32xf32>
    %125 = vector.shape_cast %124 : vector<1x8x32xf32> to vector<8x32xf32>
    %126 = vector.extract_strided_slice %80 {offsets = [2, 0, 0], sizes = [1, 8, 32], strides = [1, 1, 1]} : vector<3x8x32xf32> to vector<1x8x32xf32>
    %127 = vector.shape_cast %126 : vector<1x8x32xf32> to vector<8x32xf32>
    %128 = vector.extract_strided_slice %76 {offsets = [2, 0, 0], sizes = [1, 1, 32], strides = [1, 1, 1]} : vector<3x1x32xf32> to vector<1x1x32xf32>
    %129 = vector.shape_cast %128 : vector<1x1x32xf32> to vector<1x32xf32>
    %cst_34 = arith.constant 1.000000e+00 : f32
    %130 = vector.broadcast %cst_34 : f32 to vector<8x1xf32>
    %131 = arith.subf %130, %117 : vector<8x1xf32>
    %132 = arith.mulf %117, %131 : vector<8x1xf32>
    %cst_35 = arith.constant 1.250000e-01 : f32
    %133 = vector.broadcast %cst_35 : f32 to vector<8x1xf32>
    %134 = arith.mulf %132, %133 : vector<8x1xf32>
    %135 = vector.broadcast %134 : vector<8x1xf32> to vector<8x32xf32>
    %136 = vector.broadcast %12 : vector<1x32xf32> to vector<8x32xf32>
    %137 = arith.mulf %135, %136 : vector<8x32xf32>
    %cst_36 = arith.constant 0.000000e+00 : f32
    %138 = vector.broadcast %cst_36 : f32 to vector<8x32xf32>
    %139 = arith.cmpf ogt, %125, %138 : vector<8x32xf32>
    %cst_37 = arith.constant 0.000000e+00 : f32
    %140 = vector.broadcast %cst_37 : f32 to vector<8x32xf32>
    %141 = arith.select %139, %137, %140 : vector<8x32xi1>, vector<8x32xf32>
    %142 = vector.broadcast %10 : vector<1x32xf32> to vector<8x32xf32>
    %143 = arith.mulf %141, %142 : vector<8x32xf32>
    %cst_38 = arith.constant dense<0.000000e+00> : vector<32xf32>
    %144 = vector.multi_reduction <add>, %143, %cst_38 [0] : vector<8x32xf32> to vector<32xf32>
    %145 = vector.shape_cast %144 : vector<32xf32> to vector<1x32xf32>
    %cst_39 = arith.constant 8.000000e+00 : f32
    %146 = vector.broadcast %cst_39 : f32 to vector<1x32xf32>
    %147 = arith.divf %145, %146 : vector<1x32xf32>
    %148 = vector.broadcast %147 : vector<1x32xf32> to vector<8x32xf32>
    %149 = arith.subf %143, %148 : vector<8x32xf32>
    %150 = arith.mulf %143, %127 : vector<8x32xf32>
    %cst_40 = arith.constant dense<0.000000e+00> : vector<32xf32>
    %151 = vector.multi_reduction <add>, %150, %cst_40 [0] : vector<8x32xf32> to vector<32xf32>
    %152 = vector.shape_cast %151 : vector<32xf32> to vector<1x32xf32>
    %cst_41 = arith.constant 8.000000e+00 : f32
    %153 = vector.broadcast %cst_41 : f32 to vector<1x32xf32>
    %154 = arith.divf %152, %153 : vector<1x32xf32>
    %155 = vector.broadcast %154 : vector<1x32xf32> to vector<8x32xf32>
    %156 = arith.mulf %127, %155 : vector<8x32xf32>
    %157 = arith.subf %149, %156 : vector<8x32xf32>
    %158 = vector.broadcast %129 : vector<1x32xf32> to vector<8x32xf32>
    %159 = arith.mulf %158, %157 : vector<8x32xf32>
    %cst_42 = arith.constant dense<0.000000e+00> : vector<8x32xf32>
    %160 = tpu.matmul %159, %5, %cst_42 {dimension_numbers = #tpu.dot_dimension_numbers<[1], [0], [0], [1], [0, 0, 1, 1], [], []>} : vector<8x32xf32>, vector<32x32xf32>, vector<8x32xf32> -> vector<8x32xf32>
    %cst_43 = arith.constant 0.000000e+00 : f32
    %161 = vector.broadcast %cst_43 : f32 to vector<8x32xf32>
    %162 = arith.cmpf ogt, %119, %161 : vector<8x32xf32>
    %cst_44 = arith.constant 0.000000e+00 : f32
    %163 = vector.broadcast %cst_44 : f32 to vector<8x32xf32>
    %164 = arith.select %162, %160, %163 : vector<8x32xi1>, vector<8x32xf32>
    %165 = vector.broadcast %7 : vector<1x32xf32> to vector<8x32xf32>
    %166 = arith.mulf %164, %165 : vector<8x32xf32>
    %cst_45 = arith.constant dense<0.000000e+00> : vector<32xf32>
    %167 = vector.multi_reduction <add>, %166, %cst_45 [0] : vector<8x32xf32> to vector<32xf32>
    %168 = vector.shape_cast %167 : vector<32xf32> to vector<1x32xf32>
    %cst_46 = arith.constant 8.000000e+00 : f32
    %169 = vector.broadcast %cst_46 : f32 to vector<1x32xf32>
    %170 = arith.divf %168, %169 : vector<1x32xf32>
    %171 = vector.broadcast %170 : vector<1x32xf32> to vector<8x32xf32>
    %172 = arith.subf %166, %171 : vector<8x32xf32>
    %173 = arith.mulf %166, %121 : vector<8x32xf32>
    %cst_47 = arith.constant dense<0.000000e+00> : vector<32xf32>
    %174 = vector.multi_reduction <add>, %173, %cst_47 [0] : vector<8x32xf32> to vector<32xf32>
    %175 = vector.shape_cast %174 : vector<32xf32> to vector<1x32xf32>
    %cst_48 = arith.constant 8.000000e+00 : f32
    %176 = vector.broadcast %cst_48 : f32 to vector<1x32xf32>
    %177 = arith.divf %175, %176 : vector<1x32xf32>
    %178 = vector.broadcast %177 : vector<1x32xf32> to vector<8x32xf32>
    %179 = arith.mulf %121, %178 : vector<8x32xf32>
    %180 = arith.subf %172, %179 : vector<8x32xf32>
    %181 = vector.broadcast %123 : vector<1x32xf32> to vector<8x32xf32>
    %182 = arith.mulf %181, %180 : vector<8x32xf32>
    %cst_49 = arith.constant dense<0.000000e+00> : vector<8x32xf32>
    %183 = tpu.matmul %182, %4, %cst_49 {dimension_numbers = #tpu.dot_dimension_numbers<[1], [0], [0], [1], [0, 0, 1, 1], [], []>} : vector<8x32xf32>, vector<32x32xf32>, vector<8x32xf32> -> vector<8x32xf32>
    %184 = arith.mulf %183, %183 : vector<8x32xf32>
    %cst_50 = arith.constant dense<0.000000e+00> : vector<8xf32>
    %185 = vector.multi_reduction <add>, %184, %cst_50 [1] : vector<8x32xf32> to vector<8xf32>
    %186 = vector.shape_cast %185 : vector<8xf32> to vector<8x1xf32>
    %187 = math.sqrt %186 : vector<8x1xf32>
    %cst_51 = arith.constant 1.000000e+00 : f32
    %188 = vector.broadcast %cst_51 : f32 to vector<8x1xf32>
    %189 = arith.subf %187, %188 : vector<8x1xf32>
    %190 = arith.mulf %189, %189 : vector<8x1xf32>
    %cst_52 = arith.constant dense<0.000000e+00> : vector<1xf32>
    %191 = vector.multi_reduction <add>, %190, %cst_52 [0] : vector<8x1xf32> to vector<1xf32>
    %192 = vector.shape_cast %191 : vector<1xf32> to vector<1x1xf32>
    %cst_53 = arith.constant 8.000000e+00 : f32
    %193 = vector.broadcast %cst_53 : f32 to vector<1x1xf32>
    %194 = arith.divf %192, %193 : vector<1x1xf32>
    %195 = arith.subf %109, %115 : vector<1x1xf32>
    %cst_54 = arith.constant 1.000000e+01 : f32
    %196 = vector.broadcast %cst_54 : f32 to vector<1x1xf32>
    %197 = arith.mulf %196, %194 : vector<1x1xf32>
    %198 = arith.subf %195, %197 : vector<1x1xf32>
    %c0_55 = arith.constant 0 : index
    %c0_56 = arith.constant 0 : index
    %199 = vector.load %arg6[%c0_55, %c0_56] : memref<1x1xf32, #tpu.memory_space<vmem>>, vector<1x1xf32>
    tpu.vector_store %arg6[%c0_55, %c0_56], %198 {strides = array<i32>} : memref<1x1xf32, #tpu.memory_space<vmem>>, vector<1x1xf32>,
    return
  }
}

</mosaic_0001>

<bundles_post_ra>
// kernel: tpu_custom_call.1
= control target key start
LH: loop header
LB: loop body
LE: loop exit
PB: predicated region body
PF: predicated region fallthrough
CT: control target
= control target key end

     0   :  { %11 = vsyncpa [#allocation3], 0  ;;  %s1023_s0 = inlined_call_operand.vmem [shape: f32[8,32], index: 0, kind: input, shape index: {}]   ;;  %s1024_s1 = inlined_call_operand.hbm [shape: f32[8,32], index: 1, kind: input, shape index: {}]   ;;  %s1025_s2 = inlined_call_operand.vmem [shape: f32[8,1], index: 2, kind: input, shape index: {}]   ;;  %s1026_s3 = inlined_call_operand.hbm [shape: f32[8,32], index: 3, kind: input, shape index: {}]   ;;  %s1027_s4 = inlined_call_operand.hbm [shape: f32[32,32], index: 4, kind: input, shape index: {}]   ;;  %s1028_s5 = inlined_call_operand.hbm [shape: f32[32,32], index: 5, kind: input, shape index: {}]   ;;  %s1029_s6 = inlined_call_operand.hbm [shape: f32[1,1], index: 6, kind: output, shape index: {}]  }
   0x1   :  { %12 = vsyncpa [#allocation6], 0 }
   0x2   :  { %13 = vsyncpa [#allocation9], 0  ;;  %s35_s23 = sshll.u32 %s1026_s3, 4  ;;  %s36_s23 = int_to_ptr.hbm [resolvable:$true] %s35_s23 }
   0x3   :  { %14 = vsyncpa [#allocation4], 0  ;;  %s808_s24 = smov [#allocation5]   ;;  %s22_s28 = sshll.u32 %s1024_s1, 4  ;;  %s23_s28 = int_to_ptr.hbm [resolvable:$true] %s22_s28 }
   0x4   :  { %s37_s25 = sshll.u32 %s808_s24, 4  ;;  %s809_s29 = smov [#allocation2]   ;;  %s38_s25 = int_to_ptr.vmem [resolvable:$true] %s37_s25 }
   0x5   :  { %40 = dma.hbm_to_vmem [thread:$0]  %s36_s23, 128, %s38_s25, [#allocation6]  }
   0x6   :  { %s24_s30 = sshll.u32 %s809_s29, 4  ;;  %s45_s9 = sshll.u32 %s1027_s4, 4  ;;  %s25_s30 = int_to_ptr.vmem [resolvable:$true] %s24_s30  ;;  %s46_s9 = int_to_ptr.hbm [resolvable:$true] %s45_s9 }
   0x7   :  { %27 = dma.hbm_to_vmem [thread:$0]  %s23_s28, 128, %s25_s30, [#allocation3]  }
   0x8   :  { %s810_s3 = smov [#allocation7]   ;;  %s58_s13 = sshll.u32 %s1028_s5, 4  ;;  %s59_s13 = int_to_ptr.hbm [resolvable:$true] %s58_s13 }
   0x9   :  { %s47_s10 = sshll.u32 %s810_s3, 4  ;;  %s811_s14 = smov 128   ;;  %s48_s10 = int_to_ptr.vmem [resolvable:$true] %s47_s10 }
   0xa   :  { %s812_s1 = smov 8   ;;  %s813_s15 = smov [#allocation8]  }
   0xb   :  { %53 = dma.hbm_to_vmem [thread:$0]  %s46_s9, 512, %s48_s10, [#allocation6], %s811_s14, %s811_s14, %s812_s1  }
   0xc   :  { %s60_s16 = sshll.u32 %s813_s15, 4  ;;  %s61_s16 = int_to_ptr.vmem [resolvable:$true] %s60_s16 }
   0xd   :  { %66 = dma.hbm_to_vmem [thread:$0]  %s59_s13, 512, %s61_s16, [#allocation9], %s811_s14, %s811_s14, %s812_s1  }
   0xe   :  { %800 = dma.done.wait [#allocation3], 128  }
   0xf   :  { %801 = vsyncadd [#allocation3], 4294967168 }
  0x10   :  { %802 = dma.done.wait [#allocation6], 640  }
  0x11   :  { %803 = vsyncadd [#allocation6], 4294966656 }
  0x12   :  { %804 = dma.done.wait [#allocation9], 512  }
  0x13   :  { %805 = vsyncadd [#allocation9], 4294966784  ;;  %v814_v0 = vmov 0   ;;  %vm96_vm0 = vcmask 261120   ;;  %v864_v1 = vld [vmem:[#allocation7 + $0x18] sm:$0xff]  ;;  %v870_v2 = vld [vmem:[#allocation7 + $0x10] sm:$0xff] }
  0x14   :  { %656 = vset.pattern.permute.xlu0 %v814_v0  ;;  %657 = vset.pattern.permute.xlu1 %v814_v0  ;;  %v85_v3 = vld [vmem:[%s1025_s2] sm:$0xff]  ;;  %v879_v4 = vld [vmem:[#allocation7 + $0x8] sm:$0xff]  ;;  %v885_v6 = vld [vmem:[#allocation7] sm:$0xff]  ;;  %v815_v9 = vmov 8.0   ;;  %s615_s21 = sshll.u32 %s1029_s6, 4  ;;  %s616_s21 = int_to_ptr.hbm [resolvable:$true] %s615_s21 }
  0x15   :  { %627 = vmatpush.xpose.msk.msra.mxu0 %vm96_vm0, %v864_v1  ;;  %632 = vmatpush.xpose.msk.msra.mxu1 %vm96_vm0, %v864_v1  ;;  %v161_v5 = vsub.f32 1.0, %v85_v3  ;;  %v83_v7 = vld [vmem:[%s1023_s0] sm:$0xff]  ;;  %658 = vrcp.f32 %v815_v9  ;;  %v896_v12 = vld [vmem:[#allocation5] sm:$0xff]  ;;  %s816_s0 = smov [#allocation10]  }
  0x16   :  { %157 = vperm.xlu0 %656, %v85_v3   ;;  %v84_v8 = vld [vmem:[#allocation2] sm:$0xff]  ;;  %v95_v13 = vperm.slane %v896_v12, 0  ;;  %v94_v52 = vld [vmem:[#allocation8 + $0x18] sm:$0xff]  ;;  %s613_s18 = sshll.u32 %s816_s0, 4  ;;  %s614_s18 = int_to_ptr.vmem [resolvable:$true] %s613_s18 }
  0x17   :  { %637 = vmatpush.xpose.msk.msra.mxu2 %vm96_vm0, %v94_v52  ;;  %523 = vmatpush.msra.mxu3 %v94_v52  ;;  %v93_v59 = vld [vmem:[#allocation8 + $0x10] sm:$0xff] }
  0x19   :  { %628 = vmatpush.xpose.msk.msra.mxu0 %vm96_vm0, %v870_v2  ;;  %633 = vmatpush.xpose.msk.msra.mxu1 %vm96_vm0, %v870_v2 }
  0x1a   :  { %524 = vmatpush.msra.mxu3 %v93_v59 }
  0x1b   :  { %v659_v11 = vpop.eup %658  ;;  %638 = vmatpush.xpose.msk.msra.mxu2 %vm96_vm0, %v93_v59 }
  0x1c   :  { %v191_v14 = vmul.f32 8.0, %v659_v11  ;;  %vm195_vm1 = vweird.f32 %v659_v11 }
  0x1d   :  { %629 = vmatpush.xpose.msk.msra.mxu0 %vm96_vm0, %v879_v4  ;;  %634 = vmatpush.xpose.msk.msra.mxu1 %vm96_vm0, %v879_v4 }
  0x1e   :  { %164 = vperm.xlu0 %656, %v161_v5   ;;  %v192_v19 = vsub.f32 1.0, %v191_v14  ;;  %v92_v5 = vld [vmem:[#allocation8 + $0x8] sm:$0xff]  ;;  %v91_v14 = vld [vmem:[#allocation8] sm:$0xff] }
  0x1f   :  { %639 = vmatpush.xpose.msk.msra.mxu2 %vm96_vm0, %v92_v5  ;;  %525 = vmatpush.msra.mxu3 %v92_v5 }
  0x20   :  { %v193_v27 = vmul.f32 %v659_v11, %v192_v19 }
  0x21   :  { %630 = vmatpush.xpose.msk.msra.mxu0 %vm96_vm0, %v885_v6  ;;  %635 = vmatpush.xpose.msk.msra.mxu1 %vm96_vm0, %v885_v6 }
  0x22   :  { %v194_v35 = vadd.f32 %v659_v11, %v193_v27  ;;  %526 = vmatpush.msra.mxu3 %v91_v14 }
  0x23   :  { %640 = vmatpush.xpose.msk.msra.mxu2 %vm96_vm0, %v91_v14 }
  0x24   :  { %631 = vmatmul.msk.f32.vlgmr.msra.gmra.mxu0 %vm96_vm0, %v83_v7  ;;  %636 = vmatmul.msk.f32.vlgmr.msra.gmra.mxu1 %vm96_vm0, %v84_v8  ;;  %v902_v42 = vsel %vm195_vm1, %v659_v11, %v194_v35 }
  0x25   :  { %570 = vmatpush.msrb.mxu3 %v864_v1 }
  0x27   :  { %571 = vmatpush.msrb.mxu3 %v870_v2 }
  0x29   :  { %572 = vmatpush.msrb.mxu3 %v879_v4 }
  0x2b   :  { %573 = vmatpush.msrb.mxu3 %v885_v6 }
  0x88   :  { %v158_v10 = vpop.permute.xlu0 %157 }
  0x90   :  { %v165_v15 = vpop.permute.xlu0 %164 }
  0xa1   :  { %v129_v16 = vpop.f32.mrf.mxu0  ;;  %v152_v17 = vpop.f32.mrf.mxu1 }
  0xa2   :  { %v130_v18 = vadd.f32 %v129_v16, %v95_v13  ;;  %v153_v20 = vadd.f32 %v152_v17, %v95_v13 }
  0xa4   :  { %v169_v21 = vsel %vm96_vm0, %v130_v18, 0.0  ;;  %v176_v22 = vsel %vm96_vm0, %v153_v20, 0.0  ;;  %v160_v23 = vmul.f32 %v158_v10, %v130_v18  ;;  %v167_v24 = vmul.f32 %v165_v15, %v153_v20 }
  0xa5   :  { %v170_v25 = vrot.slane %v169_v21, 4  ;;  %v177_v26 = vrot.slane %v176_v22, 4 }
  0xa6   :  { %v168_v28 = vadd.f32 %v167_v24, %v160_v23 }
  0xa7   :  { %v171_v29 = vadd.f32 %v170_v25, %v169_v21  ;;  %v178_v30 = vadd.f32 %v177_v26, %v176_v22 }
  0xa8   :  { %v183_v31 = vsel %vm96_vm0, %v168_v28, 0.0 }
  0xa9   :  { %v172_v32 = vrot.slane %v171_v29, 2  ;;  %v179_v33 = vrot.slane %v178_v30, 2  ;;  %v184_v34 = vrot.slane %v183_v31, 4 }
  0xab   :  { %v173_v36 = vadd.f32 %v172_v32, %v171_v29  ;;  %v180_v37 = vadd.f32 %v179_v33, %v178_v30  ;;  %v185_v38 = vadd.f32 %v184_v34, %v183_v31 }
  0xad   :  { %v174_v39 = vrot.slane %v173_v36, 1  ;;  %v181_v40 = vrot.slane %v180_v37, 1  ;;  %v186_v41 = vrot.slane %v185_v38, 2 }
  0xaf   :  { %v175_v43 = vadd.f32 %v174_v39, %v173_v36  ;;  %v182_v44 = vadd.f32 %v181_v40, %v180_v37  ;;  %v187_v45 = vadd.f32 %v186_v41, %v185_v38  ;;  %v934_v41 = vperm.slane %v896_v12, 1 }
  0xb1   :  { %v197_v46 = vmul.f32 %v902_v42, %v175_v43  ;;  %v198_v47 = vmul.f32 %v902_v42, %v182_v44  ;;  %v188_v48 = vrot.slane %v187_v45, 1 }
  0xb3   :  { %v906_v49 = vsub.f32 %v130_v18, %v197_v46  ;;  %v908_v50 = vsub.f32 %v153_v20, %v198_v47  ;;  %v189_v51 = vadd.f32 %v188_v48, %v187_v45  ;;  %v270_v47 = vperm.slane %v896_v12, 2 }
  0xb5   :  { %v203_v53 = vmul.f32 %v906_v49, %v906_v49  ;;  %v204_v54 = vmul.f32 %v908_v50, %v908_v50  ;;  %v199_v55 = vmul.f32 %v902_v42, %v189_v51 }
  0xb7   :  { %v206_v56 = vsel %vm96_vm0, %v203_v53, 0.0  ;;  %v213_v57 = vsel %vm96_vm0, %v204_v54, 0.0  ;;  %v918_v58 = vsub.f32 %v168_v28, %v199_v55 }
  0xb8   :  { %v207_v60 = vrot.slane %v206_v56, 4  ;;  %v214_v61 = vrot.slane %v213_v57, 4 }
  0xb9   :  { %v205_v62 = vmul.f32 %v918_v58, %v918_v58 }
  0xba   :  { %v208_v63 = vadd.f32 %v207_v60, %v206_v56  ;;  %v215_v0 = vadd.f32 %v214_v61, %v213_v57 }
  0xbb   :  { %v220_v3 = vsel %vm96_vm0, %v205_v62, 0.0  ;;  %v324_v62 = vperm.slane %v896_v12, 3 }
  0xbc   :  { %v209_v7 = vrot.slane %v208_v63, 2  ;;  %v216_v8 = vrot.slane %v215_v0, 2  ;;  %v221_v9 = vrot.slane %v220_v3, 4 }
  0xbe   :  { %v210_v10 = vadd.f32 %v209_v7, %v208_v63  ;;  %v217_v11 = vadd.f32 %v216_v8, %v215_v0  ;;  %v222_v13 = vadd.f32 %v221_v9, %v220_v3 }
  0xc0   :  { %v211_v15 = vrot.slane %v210_v10, 1  ;;  %v218_v16 = vrot.slane %v217_v11, 1  ;;  %v223_v17 = vrot.slane %v222_v13, 2 }
  0xc2   :  { %v212_v18 = vadd.f32 %v211_v15, %v210_v10  ;;  %v219_v19 = vadd.f32 %v218_v16, %v217_v11  ;;  %v224_v20 = vadd.f32 %v223_v17, %v222_v13 }
  0xc4   :  { %v227_v21 = vmul.f32 %v212_v18, %v902_v42  ;;  %v228_v22 = vmul.f32 %v219_v19, %v902_v42  ;;  %v225_v23 = vrot.slane %v224_v20, 1 }
  0xc6   :  { %v230_v24 = vadd.f32 1e-05, %v227_v21  ;;  %v231_v25 = vadd.f32 1e-05, %v228_v22  ;;  %v226_v26 = vadd.f32 %v225_v23, %v224_v20 }
  0xc8   :  { %660 = vrsqrt.f32 %v230_v24  ;;  %v229_v1 = vmul.f32 %v226_v26, %v902_v42  ;;  %vm239_vm4 = vweird.f32 %v230_v24  ;;  %vm249_vm6 = vweird.f32 %v231_v25 }
  0xc9   :  { %662 = vrsqrt.f32 %v231_v25 }
  0xca   :  { %v232_v27 = vadd.f32 1e-05, %v229_v1 }
  0xcc   :  { %664 = vrsqrt.f32 %v232_v27  ;;  %vm259_vm9 = vweird.f32 %v232_v27 }
  0xce   :  { %v661_v28 = vpop.eup %660 }
  0xcf   :  { %v663_v2 = vpop.eup %662  ;;  %v234_v29 = vmul.f32 %v661_v28, %v230_v24  ;;  %vm240_vm2 = vweird.f32 %v661_v28 }
  0xd0   :  { %v244_v30 = vmul.f32 %v663_v2, %v231_v25  ;;  %vm250_vm3 = vweird.f32 %v663_v2  ;;  %vm241_vm5 = vmor %vm239_vm4, %vm240_vm2 }
  0xd1   :  { %v235_v31 = vmul.f32 %v661_v28, %v234_v29  ;;  %vm251_vm7 = vmor %vm249_vm6, %vm250_vm3 }
  0xd2   :  { %v665_v32 = vpop.eup %664  ;;  %v245_v33 = vmul.f32 %v663_v2, %v244_v30 }
  0xd3   :  { %v236_v34 = vmul.f32 0.5, %v235_v31  ;;  %v254_v4 = vmul.f32 %v665_v32, %v232_v27  ;;  %vm260_vm8 = vweird.f32 %v665_v32 }
  0xd4   :  { %v246_v35 = vmul.f32 0.5, %v245_v33  ;;  %vm261_vm10 = vmor %vm259_vm9, %vm260_vm8  ;;  %vm606_vm9 = vcmask 0  }
  0xd5   :  { %v237_v36 = vsub.f32 1.5, %v236_v34  ;;  %v255_v37 = vmul.f32 %v665_v32, %v254_v4 }
  0xd6   :  { %v247_v6 = vsub.f32 1.5, %v246_v35 }
  0xd7   :  { %v238_v38 = vmul.f32 %v661_v28, %v237_v36  ;;  %v256_v39 = vmul.f32 0.5, %v255_v37 }
  0xd8   :  { %v248_v40 = vmul.f32 %v663_v2, %v247_v6 }
  0xd9   :  { %v242_v43 = vsel %vm241_vm5, %v661_v28, %v238_v38  ;;  %v257_v44 = vsub.f32 1.5, %v256_v39 }
  0xda   :  { %v263_v45 = vmul.f32 %v242_v43, %v906_v49  ;;  %v252_v46 = vsel %vm251_vm7, %v663_v2, %v248_v40  ;;  %vm458_vm7 = vcmask 7168  }
  0xdb   :  { %v264_v48 = vmul.f32 %v252_v46, %v908_v50  ;;  %v258_v52 = vmul.f32 %v665_v32, %v257_v44 }
  0xdc   :  { %v267_v51 = vmul.f32 %v934_v41, %v263_v45 }
  0xdd   :  { %v268_v55 = vmul.f32 %v934_v41, %v264_v48  ;;  %v941_v56 = vsel %vm261_vm10, %v665_v32, %v258_v52 }
  0xde   :  { %v271_v53 = vadd.f32 %v270_v47, %v267_v51  ;;  %v946_v49 = vmul.f32 %v941_v56, %v918_v58 }
  0xdf   :  { %v272_v57 = vadd.f32 %v270_v47, %v268_v55 }
  0xe0   :  { %v274_v54 = vmax.f32 %v271_v53, 0.0  ;;  %v269_v59 = vmul.f32 %v934_v41, %v946_v49 }
  0xe1   :  { %v275_v50 = vmax.f32 %v272_v57, 0.0 }
  0xe2   :  { %641 = vmatmul.msk.f32.vlgmr.msra.gmra.mxu2 %vm96_vm0, %v274_v54  ;;  %v951_v60 = vadd.f32 %v270_v47, %v269_v59 }
  0xe4   :  { %v276_v61 = vmax.f32 %v951_v60, 0.0  ;;  %vm531_vm6 = vcmp.gt.f32.partialorder %v951_v60, 0.0 }
  0xea   :  { %642 = vmatmul.msk.f32.gmra.mxu2 %vm96_vm0, %v275_v50 }
  0xf2   :  { %643 = vmatmul.msk.f32.gmra.mxu2 %vm96_vm0, %v276_v61 }
 0x165   :  { %v315_v63 = vpop.f32.mrf.mxu2 }
 0x166   :  { %v325_v0 = vadd.f32 %v324_v62, %v315_v63 }
 0x168   :  { %v328_v58 = vsel %vm96_vm0, %v325_v0, 0.0 }
 0x169   :  { %v329_v3 = vrot.slane %v328_v58, 4 }
 0x16b   :  { %v330_v5 = vadd.f32 %v329_v3, %v328_v58 }
 0x16d   :  { %v331_v7 = vrot.slane %v330_v5, 2  ;;  %v318_v8 = vpop.f32.mrf.mxu2 }
 0x16e   :  { %v326_v9 = vadd.f32 %v324_v62, %v318_v8 }
 0x16f   :  { %v332_v10 = vadd.f32 %v331_v7, %v330_v5 }
 0x170   :  { %v335_v11 = vsel %vm96_vm0, %v326_v9, 0.0 }
 0x171   :  { %v333_v13 = vrot.slane %v332_v10, 1  ;;  %v336_v14 = vrot.slane %v335_v11, 4 }
 0x173   :  { %v334_v15 = vadd.f32 %v333_v13, %v332_v10  ;;  %v337_v16 = vadd.f32 %v336_v14, %v335_v11 }
 0x175   :  { %v349_v17 = vmul.f32 %v334_v15, %v902_v42  ;;  %v338_v18 = vrot.slane %v337_v16, 2  ;;  %v321_v19 = vpop.f32.mrf.mxu2 }
 0x176   :  { %v327_v20 = vadd.f32 %v324_v62, %v321_v19 }
 0x177   :  { %v352_v21 = vsub.f32 %v325_v0, %v349_v17  ;;  %v339_v22 = vadd.f32 %v338_v18, %v337_v16  ;;  %v418_v16 = vperm.slane %v896_v12, 4 }
 0x178   :  { %v342_v23 = vsel %vm96_vm0, %v327_v20, 0.0 }
 0x179   :  { %v355_v24 = vmul.f32 %v352_v21, %v352_v21  ;;  %v340_v25 = vrot.slane %v339_v22, 1  ;;  %v343_v26 = vrot.slane %v342_v23, 4 }
 0x17b   :  { %v358_v1 = vsel %vm96_vm0, %v355_v24, 0.0  ;;  %v341_v27 = vadd.f32 %v340_v25, %v339_v22  ;;  %v344_v28 = vadd.f32 %v343_v26, %v342_v23 }
 0x17c   :  { %v359_v2 = vrot.slane %v358_v1, 4 }
 0x17d   :  { %v350_v29 = vmul.f32 %v341_v27, %v902_v42  ;;  %v345_v30 = vrot.slane %v344_v28, 2 }
 0x17e   :  { %v360_v31 = vadd.f32 %v359_v2, %v358_v1 }
 0x17f   :  { %v962_v32 = vsub.f32 %v326_v9, %v350_v29  ;;  %v346_v33 = vadd.f32 %v345_v30, %v344_v28 }
 0x180   :  { %v361_v34 = vrot.slane %v360_v31, 2 }
 0x181   :  { %v356_v4 = vmul.f32 %v962_v32, %v962_v32  ;;  %v347_v35 = vrot.slane %v346_v33, 1 }
 0x182   :  { %v362_v36 = vadd.f32 %v361_v34, %v360_v31 }
 0x183   :  { %v365_v37 = vsel %vm96_vm0, %v356_v4, 0.0  ;;  %v348_v6 = vadd.f32 %v347_v35, %v346_v33  ;;  %v982_v35 = vperm.slane %v896_v12, 6 }
 0x184   :  { %v363_v38 = vrot.slane %v362_v36, 1  ;;  %v366_v39 = vrot.slane %v365_v37, 4 }
 0x185   :  { %v351_v40 = vmul.f32 %v348_v6, %v902_v42 }
 0x186   :  { %v364_v43 = vadd.f32 %v363_v38, %v362_v36  ;;  %v367_v44 = vadd.f32 %v366_v39, %v365_v37 }
 0x187   :  { %v968_v45 = vsub.f32 %v327_v20, %v351_v40  ;;  %v422_v20 = vperm.slane %v896_v12, 5 }
 0x188   :  { %v379_v46 = vmul.f32 %v364_v43, %v902_v42  ;;  %v368_v47 = vrot.slane %v367_v44, 2 }
 0x189   :  { %v357_v48 = vmul.f32 %v968_v45, %v968_v45 }
 0x18a   :  { %v382_v51 = vadd.f32 1e-05, %v379_v46  ;;  %v369_v52 = vadd.f32 %v368_v47, %v367_v44  ;;  %v990_v46 = vperm.slane %v896_v12, 7 }
 0x18b   :  { %v372_v53 = vsel %vm96_vm0, %v357_v48, 0.0 }
 0x18c   :  { %666 = vrsqrt.f32 %v382_v51  ;;  %v370_v54 = vrot.slane %v369_v52, 1  ;;  %v373_v55 = vrot.slane %v372_v53, 4  ;;  %vm391_vm12 = vweird.f32 %v382_v51 }
 0x18e   :  { %v371_v57 = vadd.f32 %v370_v54, %v369_v52  ;;  %v374_v50 = vadd.f32 %v373_v55, %v372_v53 }
 0x190   :  { %v380_v59 = vmul.f32 %v371_v57, %v902_v42  ;;  %v375_v61 = vrot.slane %v374_v50, 2 }
 0x192   :  { %v667_v62 = vpop.eup %666  ;;  %v383_v63 = vadd.f32 1e-05, %v380_v59  ;;  %v376_v0 = vadd.f32 %v375_v61, %v374_v50 }
 0x193   :  { %v386_v58 = vmul.f32 %v667_v62, %v382_v51  ;;  %vm392_vm11 = vweird.f32 %v667_v62 }
 0x194   :  { %668 = vrsqrt.f32 %v383_v63  ;;  %v377_v3 = vrot.slane %v376_v0, 1  ;;  %vm393_vm13 = vmor %vm391_vm12, %vm392_vm11  ;;  %vm401_vm15 = vweird.f32 %v383_v63 }
 0x195   :  { %v387_v5 = vmul.f32 %v667_v62, %v386_v58 }
 0x196   :  { %v378_v7 = vadd.f32 %v377_v3, %v376_v0 }
 0x197   :  { %v388_v8 = vmul.f32 0.5, %v387_v5 }
 0x198   :  { %v381_v9 = vmul.f32 %v378_v7, %v902_v42 }
 0x199   :  { %v389_v10 = vsub.f32 1.5, %v388_v8 }
 0x19a   :  { %v669_v11 = vpop.eup %668  ;;  %v384_v13 = vadd.f32 1e-05, %v381_v9 }
 0x19b   :  { %v390_v14 = vmul.f32 %v667_v62, %v389_v10  ;;  %v396_v15 = vmul.f32 %v669_v11, %v383_v63  ;;  %vm402_vm14 = vweird.f32 %v669_v11 }
 0x19c   :  { %670 = vrsqrt.f32 %v384_v13  ;;  %vm403_vm1 = vmor %vm401_vm15, %vm402_vm14  ;;  %vm411_vm3 = vweird.f32 %v384_v13 }
 0x19d   :  { %v394_v17 = vsel %vm393_vm13, %v667_v62, %v390_v14  ;;  %v397_v18 = vmul.f32 %v669_v11, %v396_v15 }
 0x19e   :  { %v415_v19 = vmul.f32 %v394_v17, %v352_v21 }
 0x19f   :  { %v398_v22 = vmul.f32 0.5, %v397_v18 }
 0x1a0   :  { %v419_v23 = vmul.f32 %v418_v16, %v415_v19 }
 0x1a1   :  { %v399_v24 = vsub.f32 1.5, %v398_v22 }
 0x1a2   :  { %v671_v25 = vpop.eup %670  ;;  %v978_v26 = vadd.f32 %v422_v20, %v419_v23 }
 0x1a3   :  { %v400_v1 = vmul.f32 %v669_v11, %v399_v24  ;;  %v406_v27 = vmul.f32 %v671_v25, %v384_v13  ;;  %vm412_vm2 = vweird.f32 %v671_v25 }
 0x1a4   :  { %vm413_vm4 = vmor %vm411_vm3, %vm412_vm2 }
 0x1a5   :  { %v404_v28 = vsel %vm403_vm1, %v669_v11, %v400_v1  ;;  %v407_v2 = vmul.f32 %v671_v25, %v406_v27 }
 0x1a6   :  { %v416_v29 = vmul.f32 %v404_v28, %v962_v32 }
 0x1a7   :  { %v408_v30 = vmul.f32 0.5, %v407_v2 }
 0x1a8   :  { %v420_v31 = vmul.f32 %v418_v16, %v416_v29 }
 0x1a9   :  { %v409_v21 = vsub.f32 1.5, %v408_v30 }
 0x1aa   :  { %v424_v33 = vadd.f32 %v422_v20, %v420_v31 }
 0x1ab   :  { %v410_v34 = vmul.f32 %v671_v25, %v409_v21 }
 0x1ac   :  { %v427_v4 = vmax.f32 %v424_v33, 0.0 }
 0x1ad   :  { %v414_v36 = vsel %vm413_vm4, %v671_v25, %v410_v34 }
 0x1ae   :  { %v417_v37 = vmul.f32 %v414_v36, %v968_v45  ;;  %v431_v6 = vmul.f32 %v982_v35, %v427_v4 }
 0x1b0   :  { %v436_v38 = vsel %vm96_vm0, %v431_v6, 0.0  ;;  %v421_v32 = vmul.f32 %v418_v16, %v417_v37 }
 0x1b1   :  { %437 = vadd.xlane.f32.xlu0 %v436_v38 }
 0x1b2   :  { %v425_v39 = vadd.f32 %v422_v20, %v421_v32 }
 0x1b4   :  { %v428_v40 = vmax.f32 %v425_v39, 0.0  ;;  %vm484_vm5 = vcmp.gt.f32.partialorder %v425_v39, 0.0 }
 0x1b6   :  { %v432_v43 = vmul.f32 %v982_v35, %v428_v40 }
 0x1b8   :  { %v439_v44 = vsel %vm96_vm0, %v432_v43, 0.0 }
 0x1b9   :  { %440 = vadd.xlane.f32.xlu1 %v439_v44 }
 0x22c   :  { %v441_v47 = vpop.xlane.xlu1 %440 }
 0x22d   :  { %v445_v48 = vadd.f32 %v990_v46, %v441_v47 }
 0x22f   :  { %v448_v45 = vmul.f32 0.5, %v445_v48 }
 0x231   :  { %672 = vtanh.f32 %v448_v45 }
 0x237   :  { %v673_v51 = vpop.eup %672 }
 0x238   :  { %v454_v52 = vadd.f32 1.0, %v673_v51  ;;  %v426_v51 = vmax.f32 %v978_v26, 0.0 }
 0x23a   :  { %v457_v53 = vmul.f32 0.5, %v454_v52  ;;  %v430_v52 = vmul.f32 %v982_v35, %v426_v51 }
 0x23c   :  { %v475_v54 = vsub.f32 1.0, %v457_v53 }
 0x23e   :  { %v476_v55 = vmul.f32 %v475_v54, %v457_v53  ;;  %v433_v53 = vsel %vm96_vm0, %v430_v52, 0.0  ;;  %v438_v54 = vpop.xlane.xlu0 %437 }
 0x240   :  { %v477_v57 = vmul.f32 0.125, %v476_v55 }
 0x242   :  { %480 = vperm.xlu1 %657, %v477_v57  }
 0x2b4   :  { %v481_v50 = vpop.permute.xlu1 %480 }
 0x2b5   :  { %v483_v59 = vmul.f32 %v481_v50, %v982_v35 }
 0x2b7   :  { %v485_v61 = vsel %vm484_vm5, %v483_v59, 0.0 }
 0x2b8   :  { %v486_v62 = vmul.f32 %v485_v61, %v418_v16 }
 0x2ba   :  { %v487_v12 = vsel %vm96_vm0, %v486_v62, 0.0  ;;  %v496_v63 = vmul.f32 %v486_v62, %v417_v37 }
 0x2bb   :  { %v488_v0 = vrot.slane %v487_v12, 4 }
 0x2bc   :  { %v497_v58 = vsel %vm96_vm0, %v496_v63, 0.0 }
 0x2bd   :  { %v489_v3 = vadd.f32 %v488_v0, %v487_v12  ;;  %v498_v5 = vrot.slane %v497_v58, 4 }
 0x2bf   :  { %v490_v7 = vrot.slane %v489_v3, 2  ;;  %v499_v8 = vadd.f32 %v498_v5, %v497_v58 }
 0x2c1   :  { %v491_v9 = vadd.f32 %v490_v7, %v489_v3  ;;  %v500_v10 = vrot.slane %v499_v8, 2 }
 0x2c3   :  { %v492_v11 = vrot.slane %v491_v9, 1  ;;  %v501_v13 = vadd.f32 %v500_v10, %v499_v8 }
 0x2c5   :  { %v493_v14 = vadd.f32 %v492_v11, %v491_v9  ;;  %v502_v15 = vrot.slane %v501_v13, 1 }
 0x2c7   :  { %v494_v17 = vmul.f32 %v493_v14, %v902_v42  ;;  %v503_v18 = vadd.f32 %v502_v15, %v501_v13 }
 0x2c9   :  { %v504_v16 = vmul.f32 %v503_v18, %v902_v42  ;;  %v495_v19 = vsub.f32 %v486_v62, %v494_v17 }
 0x2cb   :  { %v505_v20 = vmul.f32 %v504_v16, %v417_v37 }
 0x2cd   :  { %v506_v22 = vsub.f32 %v495_v19, %v505_v20 }
 0x2cf   :  { %v507_v23 = vmul.f32 %v506_v22, %v414_v36 }
 0x2d1   :  { %644 = vmatmul.msk.f32.vlgmr.msra.gmra.mxu3 %vm96_vm0, %v507_v23 }
 0x354   :  { %v528_v24 = vpop.f32.mrf.mxu3 }
 0x355   :  { %v532_v25 = vsel %vm531_vm6, %v528_v24, 0.0 }
 0x356   :  { %v533_v1 = vmul.f32 %v532_v25, %v934_v41 }
 0x358   :  { %v534_v27 = vsel %vm96_vm0, %v533_v1, 0.0  ;;  %v543_v28 = vmul.f32 %v533_v1, %v946_v49 }
 0x359   :  { %v535_v2 = vrot.slane %v534_v27, 4 }
 0x35a   :  { %v544_v29 = vsel %vm96_vm0, %v543_v28, 0.0 }
 0x35b   :  { %v536_v30 = vadd.f32 %v535_v2, %v534_v27  ;;  %v545_v31 = vrot.slane %v544_v29, 4 }
 0x35d   :  { %v537_v21 = vrot.slane %v536_v30, 2  ;;  %v546_v33 = vadd.f32 %v545_v31, %v544_v29 }
 0x35f   :  { %v538_v34 = vadd.f32 %v537_v21, %v536_v30  ;;  %v547_v4 = vrot.slane %v546_v33, 2 }
 0x361   :  { %v539_v36 = vrot.slane %v538_v34, 1  ;;  %v548_v37 = vadd.f32 %v547_v4, %v546_v33 }
 0x363   :  { %v540_v6 = vadd.f32 %v539_v36, %v538_v34  ;;  %v549_v60 = vrot.slane %v548_v37, 1 }
 0x365   :  { %v541_v38 = vmul.f32 %v540_v6, %v902_v42  ;;  %v550_v41 = vadd.f32 %v549_v60, %v548_v37 }
 0x367   :  { %v551_v32 = vmul.f32 %v550_v41, %v902_v42  ;;  %v542_v39 = vsub.f32 %v533_v1, %v541_v38 }
 0x369   :  { %v552_v40 = vmul.f32 %v551_v32, %v946_v49  ;;  %v444_v49 = vadd.f32 %v990_v46, %v438_v54 }
 0x36b   :  { %v553_v43 = vsub.f32 %v542_v39, %v552_v40  ;;  %v447_v55 = vmul.f32 0.5, %v444_v49 }
 0x36d   :  { %v554_v44 = vmul.f32 %v553_v43, %v941_v56  ;;  %674 = vtanh.f32 %v447_v55 }
 0x36f   :  { %645 = vmatmul.msk.f32.vlgmr.msrb.gmra.mxu3 %vm96_vm0, %v554_v44 }
 0x373   :  { %v675_v56 = vpop.eup %674 }
 0x374   :  { %v453_v50 = vadd.f32 1.0, %v675_v56 }
 0x376   :  { %v456_v59 = vmul.f32 0.5, %v453_v50 }
 0x378   :  { %v467_v35 = vsel %vm458_vm7, %v456_v59, 0.0 }
 0x379   :  { %v468_v3 = vrot.slane %v467_v35, 4 }
 0x37b   :  { %v469_v8 = vadd.f32 %v468_v3, %v467_v35 }
 0x37d   :  { %v470_v15 = vrot.slane %v469_v8, 2 }
 0x37f   :  { %v471_v20 = vadd.f32 %v470_v15, %v469_v8 }
 0x381   :  { %v472_v1 = vrot.slane %v471_v20, 1 }
 0x383   :  { %v473_v30 = vadd.f32 %v472_v1, %v471_v20 }
 0x385   :  { %v474_v36 = vmul.f32 %v473_v30, %v902_v42 }
 0x3f2   :  { %v575_v47 = vpop.f32.mrf.mxu3 }
 0x3f3   :  { %v578_v48 = vmul.f32 %v575_v47, %v575_v47 }
 0x3f5   :  { %v579_v45 = vsel %vm96_vm0, %v578_v48, 0.0 }
 0x3f6   :  { %580 = vadd.xlane.f32.xlu2 %v579_v45 }
 0x3fe   :  { %434 = vadd.xlane.f32.xlu2 %v433_v53 }
 0x469   :  { %v581_v57 = vpop.xlane.xlu2 %580 }
 0x46a   :  { %676 = vrsqrt.f32 %v581_v57  ;;  %vm589_vm0 = vcmp.eq.f32.partialorder %v581_v57, inf  ;;  %v592_v11 = vand.u32 2147483648, %v581_v57  ;;  %vm591_vm8 = vcmp.eq.f32.partialorder %v581_v57, 0.0 }
 0x470   :  { %v677_v61 = vpop.eup %676 }
 0x471   :  { %v583_v62 = vmul.f32 %v677_v61, %v581_v57  ;;  %v435_v26 = vpop.xlane.xlu2 %434 }
 0x472   :  { %v443_v12 = vadd.f32 %v990_v46, %v435_v26 }
 0x473   :  { %v584_v63 = vmul.f32 %v677_v61, %v583_v62 }
 0x474   :  { %v446_v0 = vmul.f32 0.5, %v443_v12 }
 0x475   :  { %v585_v58 = vmul.f32 0.5, %v584_v63 }
 0x476   :  { %678 = vtanh.f32 %v446_v0 }
 0x477   :  { %v586_v5 = vsub.f32 1.5, %v585_v58 }
 0x479   :  { %v587_v7 = vmul.f32 %v677_v61, %v586_v5 }
 0x47b   :  { %v588_v9 = vmul.f32 %v587_v7, %v581_v57 }
 0x47c   :  { %v679_v10 = vpop.eup %678 }
 0x47d   :  { %v590_v13 = vsel %vm589_vm0, %v581_v57, %v588_v9  ;;  %v452_v14 = vadd.f32 1.0, %v679_v10 }
 0x47e   :  { %v593_v17 = vsel %vm591_vm8, %v592_v11, %v590_v13 }
 0x47f   :  { %v646_v46 = vadd.f32 -1.0, %v593_v17  ;;  %v455_v18 = vmul.f32 0.5, %v452_v14 }
 0x481   :  { %v459_v16 = vsel %vm458_vm7, %v455_v18, 0.0  ;;  %v595_v19 = vmul.f32 %v646_v46, %v646_v46 }
 0x482   :  { %v460_v22 = vrot.slane %v459_v16, 4 }
 0x483   :  { %v596_v23 = vrot.slane %v595_v19, 4 }
 0x484   :  { %v461_v24 = vadd.f32 %v460_v22, %v459_v16 }
 0x485   :  { %v597_v25 = vadd.f32 %v596_v23, %v595_v19 }
 0x486   :  { %v462_v27 = vrot.slane %v461_v24, 2 }
 0x487   :  { %v598_v28 = vrot.slane %v597_v25, 2 }
 0x488   :  { %v463_v2 = vadd.f32 %v462_v27, %v461_v24 }
 0x489   :  { %v599_v29 = vadd.f32 %v598_v28, %v597_v25 }
 0x48a   :  { %v464_v31 = vrot.slane %v463_v2, 1 }
 0x48b   :  { %v600_v21 = vrot.slane %v599_v29, 1 }
 0x48c   :  { %v465_v33 = vadd.f32 %v464_v31, %v463_v2 }
 0x48d   :  { %v601_v34 = vadd.f32 %v600_v21, %v599_v29 }
 0x48e   :  { %v466_v4 = vmul.f32 %v465_v33, %v902_v42 }
 0x48f   :  { %v602_v37 = vmul.f32 %v601_v34, %v902_v42 }
 0x490   :  { %v603_v6 = vsub.f32 %v466_v4, %v474_v36 }
 0x491   :  { %v604_v60 = vmul.f32 10.0, %v602_v37 }
 0x493   :  { %v605_v38 = vsub.f32 %v603_v6, %v604_v60 }
 0x495   :  { %607 = vst.msk [vmem:[#allocation10] sm:$0x1] %vm606_vm9, %v605_v38 }
 0x496   :  { %618 = dma.vmem_to_hbm [thread:$0]  %s614_s18, 16, %s616_s21, [#allocation4]  }
 0x497   :  { %806 = dma.done.wait [#allocation4], 16  }
 0x498   :  { %807 = vsyncadd [#allocation4], 4294967280 }
 0x499   :  { %623 = vsyncpa [#allocation3], 1 }
 0x49a   :  { %624 = vsyncpa [#allocation6], 1 }
 0x49b   :  { %625 = vsyncpa [#allocation9], 1 }
 0x49c   :  { %626 = vsyncpa [#allocation4], 1 }

</bundles_post_ra>
